<compile_context>
chip_gen: v5e
topology: v5e:2x2
jax: 0.10.0
libtpu: 0.0.40
codegen_flags: <defaults>
</compile_context>

<pallas_src>
import functools

import jax
import jax.numpy as jnp
import numpy as np
from jax import lax
from jax.experimental import pallas as pl
from jax.experimental.pallas import tpu as pltpu


# ------------------------------ sizing helpers -------------------------------
def _round_up(x, m):
    return ((x + m - 1) // m) * m


def _tpu_generation():
    try:
        kind = jax.devices()[0].device_kind.lower()
    except Exception:
        return 6
    if "v7" in kind:
        return 7
    if "v5" in kind or "v4" in kind:
        return 5
    return 6


def _vmem_limit(gen):
    # v7x: 64 MiB physical VMEM -> stay well under; v5e/v6e: 128 MiB physical.
    return (40 << 20) if gen >= 7 else (64 << 20)


def _choose_ts(T):
    """Time-block size (capped so the unrolled recurrence stays register-friendly)."""
    for ts in range(min(T, 16), 0, -1):
        if T % ts == 0:
            return ts
    return T


def _choose_bb(B):
    """Batch-block size for the parallel LSTM grid axis."""
    for bb in (8, 4, 2, 1):
        if B % bb == 0:
            return bb
    return B


def _choose_tm(M, gen):
    cands = (128, 64, 32, 16, 8) if gen == 5 else (256, 128, 64, 32, 16, 8)
    for tm in cands:
        if M % tm == 0:
            return tm
    return M


def _choose_tv(Vp, gen):
    cands = (1024, 512, 256, 128) if gen >= 7 else (2048, 1024, 512, 256, 128)
    for tv in cands:
        if Vp % tv == 0:
            return tv
    return 128


# --------------------------- Kernel 1: LSTM recurrence -----------------------
def _lstm_kernel(x_ref, wih_ref, whh_ref, b_ref, h_out_ref, h_sc, c_sc):
    """One grid step = TS time steps of the LSTM for one batch block.

    x_ref    : (BB, TS, E)  bf16 input block
    wih_ref  : (E, 4H)      bf16 input-to-hidden weights (pre-transposed)
    whh_ref  : (H, 4H)      bf16 hidden-to-hidden weights (pre-transposed)
    b_ref    : (1, 4H)      f32 pre-summed bias (b_ih + b_hh)
    h_out_ref: (BB, TS*H)   bf16 lane-dense hidden-state block
    h_sc/c_sc: (BB, H)      f32 recurrent state, persists across the time axis
    """
    t = pl.program_id(1)          # time-axis grid index (innermost, "arbitrary")

    @pl.when(t == 0)
    def _():
        h_sc[...] = jnp.zeros_like(h_sc)
        c_sc[...] = jnp.zeros_like(c_sc)

    BB, TS, E = x_ref.shape
    H = h_sc.shape[1]

    # Hoisted input projection: one (BB*TS, E) @ (E, 4H) MXU GEMM off the
    # serial chain; bf16 operands, f32 accumulation; bias already folded.
    gx = jnp.dot(x_ref[...].reshape(BB * TS, E), wih_ref[...],
                 preferred_element_type=jnp.float32) + b_ref[...]
    gx = gx.reshape(BB, TS, 4 * H)

    whh = whh_ref[...]                                    # hoisted single vld
    lane = lax.broadcasted_iota(jnp.int32, (BB, 4 * H), 1)
    g_mask = (lane >= 2 * H) & (lane < 3 * H)             # hoisted g-gate mask

    h = h_sc[...]
    c = c_sc[...]
    hs = []
    for s in range(TS):           # fully unrolled; only h @ W_hh is serial
        gates = gx[:, s, :] + jnp.dot(h.astype(jnp.bfloat16), whh,
                                      preferred_element_type=jnp.float32)
        # One full-width sigmoid + one full-width tanh, g selected by lane mask
        acts = jnp.where(g_mask, jnp.tanh(gates), jax.nn.sigmoid(gates))
        i_g = acts[:, 0 * H:1 * H]
        f_g = acts[:, 1 * H:2 * H]
        g_g = acts[:, 2 * H:3 * H]
        o_g = acts[:, 3 * H:4 * H]
        c = f_g * c + i_g * g_g
        h = o_g * jnp.tanh(c)
        hs.append(h)

    # Single lane-dense store of the whole time block.
    h_out_ref[...] = jnp.concatenate(hs, axis=-1).astype(h_out_ref.dtype)

    h_sc[...] = h
    c_sc[...] = c


def lstm_pallas(seq_bte, w_ih, w_hh, b_ih, b_hh, *, vmem_limit):
    """seq_bte: (B, T, E) f32 batch-first. Returns hidden states (B, T*H) bf16."""
    B, T, E = seq_bte.shape
    H4 = w_ih.shape[0]
    H = H4 // 4
    TS = _choose_ts(T)
    BB = _choose_bb(B)

    x_bf = seq_bte.astype(jnp.bfloat16)
    wih_t = jnp.transpose(w_ih).astype(jnp.bfloat16)      # (E, 4H)
    whh_t = jnp.transpose(w_hh).astype(jnp.bfloat16)      # (H, 4H)
    b = (b_ih + b_hh).astype(jnp.float32).reshape(1, H4)  # folded bias

    return pl.pallas_call(
        _lstm_kernel,
        out_shape=jax.ShapeDtypeStruct((B, T * H), jnp.bfloat16),
        grid_spec=pltpu.PrefetchScalarGridSpec(
            num_scalar_prefetch=0,
            grid=(B // BB, T // TS),
            in_specs=[
                pl.BlockSpec((BB, TS, E), lambda b, t: (b, t, 0)),
                pl.BlockSpec((E, H4), lambda b, t: (0, 0)),
                pl.BlockSpec((H, H4), lambda b, t: (0, 0)),
                pl.BlockSpec((1, H4), lambda b, t: (0, 0)),
            ],
            out_specs=pl.BlockSpec((BB, TS * H), lambda b, t: (b, t)),
            scratch_shapes=[
                pltpu.VMEM((BB, H), jnp.float32),   # h state
                pltpu.VMEM((BB, H), jnp.float32),   # c state
            ],
        ),
        compiler_params=pltpu.CompilerParams(
            dimension_semantics=("parallel", "arbitrary"),
            vmem_limit_bytes=vmem_limit),
    )(x_bf, wih_t, whh_t, b)


# ------------------------ Kernel 2: vocab projection -------------------------
def _proj_kernel(h_ref, w_ref, b_ref, out_ref):
    """One grid step = one (row-tile, vocab-tile) of (B*T, H) @ (H, V).

    h_ref: (TM, H) bf16 | w_ref: (H, TV) bf16 | b_ref: (1, TV) f32 | out_ref: (TM, TV) f32
    """
    out_ref[...] = (jnp.dot(h_ref[...], w_ref[...],
                            preferred_element_type=jnp.float32)
                    + b_ref[...]).astype(out_ref.dtype)


def vocab_proj_pallas(h_2d, w_lin, b_lin, *, gen, vmem_limit):
    """h_2d: (M, H) bf16. Returns logits (M, V) f32."""
    M, H = h_2d.shape
    V = w_lin.shape[0]
    Vp = _round_up(V, 128)                      # pad vocab to lane-dense tiles
    TV = _choose_tv(Vp, gen)
    TM = _choose_tm(M, gen)

    wlin_t = jnp.transpose(w_lin).astype(jnp.bfloat16)   # (H, V)
    blin = b_lin.astype(jnp.float32)
    if Vp != V:
        wlin_t = jnp.pad(wlin_t, ((0, 0), (0, Vp - V)))
        blin = jnp.pad(blin, (0, Vp - V))
    blin = blin.reshape(1, Vp)

    out = pl.pallas_call(
        _proj_kernel,
        out_shape=jax.ShapeDtypeStruct((M, Vp), jnp.float32),
        grid_spec=pltpu.PrefetchScalarGridSpec(
            num_scalar_prefetch=0,
            grid=(M // TM, Vp // TV),
            in_specs=[
                pl.BlockSpec((TM, H), lambda i, j: (i, 0)),
                pl.BlockSpec((H, TV), lambda i, j: (0, j)),
                pl.BlockSpec((1, TV), lambda i, j: (0, j)),
            ],
            out_specs=pl.BlockSpec((TM, TV), lambda i, j: (i, j)),
        ),
        compiler_params=pltpu.CompilerParams(
            dimension_semantics=("parallel", "parallel"),
            vmem_limit_bytes=vmem_limit),
    )(h_2d, wlin_t, blin)
    return out[:, :V] if Vp != V else out


# --------------------- Kernel 3: EncoderCNN embed Linear ---------------------
def _embed_kernel(x_ref, w_ref, b_ref, out_ref):
    """(B, F) @ (F, E) + b — the `self.embed` Linear of EncoderCNN."""
    out_ref[...] = (jnp.dot(x_ref[...], w_ref[...],
                            preferred_element_type=jnp.float32)
                    + b_ref[...]).astype(out_ref.dtype)


def encoder_embed_pallas(feats, w, b, *, vmem_limit):
    """feats: (B, F) f32; w: (E, F); b: (E,). Returns (B, E) f32."""
    B, F = feats.shape
    E = w.shape[0]
    return pl.pallas_call(
        _embed_kernel,
        out_shape=jax.ShapeDtypeStruct((B, E), jnp.float32),
        grid_spec=pltpu.PrefetchScalarGridSpec(
            num_scalar_prefetch=0,
            grid=(1,),
            in_specs=[
                pl.BlockSpec((B, F), lambda i: (0, 0)),
                pl.BlockSpec((F, E), lambda i: (0, 0)),
                pl.BlockSpec((1, E), lambda i: (0, 0)),
            ],
            out_specs=pl.BlockSpec((B, E), lambda i: (0, 0)),
        ),
        compiler_params=pltpu.CompilerParams(
            dimension_semantics=("arbitrary",),
            vmem_limit_bytes=vmem_limit),
    )(feats.astype(jnp.bfloat16), jnp.transpose(w).astype(jnp.bfloat16),
      b.astype(jnp.float32).reshape(1, E))


# ------------------------------- EncoderCNN ----------------------------------
class EncoderCNNPallas:
    # TODO(synk): pretrained ResNet-50 backbone not implemented; forward takes
    #             the backbone's pooled output (B, 2048, 1, 1) instead of images.
    IN_FEATURES = 2048

    def __init__(self, embed_size, key):
        k = 1.0 / np.sqrt(self.IN_FEATURES)
        kw, kb = jax.random.split(key)
        self.w = jax.random.uniform(kw, (embed_size, self.IN_FEATURES),
                                    jnp.float32, -k, k)
        self.b = jax.random.uniform(kb, (embed_size,), jnp.float32, -k, k)

    @functools.partial(jax.jit, static_argnums=0)
    def forward(self, pooled):
        feats = pooled.reshape(pooled.shape[0], -1)        # .view(B, -1)
        return encoder_embed_pallas(feats, self.w, self.b,
                                    vmem_limit=_vmem_limit(_tpu_generation()))


# ------------------------------- DecoderRNN ----------------------------------
class DecoderRNNPallas:
    def __init__(self, embed_size, hidden_size, vocab_size, num_layers=1,
                 key=jax.random.PRNGKey(0)):
        assert num_layers == 1, "single-layer LSTM (module default)"
        self.E, self.H, self.V = embed_size, hidden_size, vocab_size
        k = 1.0 / np.sqrt(hidden_size)
        ks = jax.random.split(key, 7)
        self.emb = jax.random.uniform(ks[0], (vocab_size, embed_size),
                                      jnp.float32, -0.1, 0.1)
        # PyTorch LSTM init uniform(-1/sqrt(H), 1/sqrt(H)), gate order i,f,g,o
        self.w_ih = jax.random.uniform(ks[1], (4 * hidden_size, embed_size),
                                       jnp.float32, -k, k)
        self.w_hh = jax.random.uniform(ks[2], (4 * hidden_size, hidden_size),
                                       jnp.float32, -k, k)
        self.b_ih = jax.random.uniform(ks[3], (4 * hidden_size,), jnp.float32, -k, k)
        self.b_hh = jax.random.uniform(ks[4], (4 * hidden_size,), jnp.float32, -k, k)
        self.w_lin = jax.random.uniform(ks[5], (vocab_size, hidden_size),
                                        jnp.float32, -k, k)
        self.b_lin = jax.random.uniform(ks[6], (vocab_size,), jnp.float32, -k, k)

    @functools.partial(jax.jit, static_argnums=0)
    def forward(self, features, captions):
        # features: (B, E) f32, captions: (B, L) int32
        captions = captions[:, :-1]
        embeddings = jnp.take(self.emb, captions, axis=0)                  # (B, L-1, E)
        seq = jnp.concatenate([features[:, None, :], embeddings], axis=1)  # (B, T, E)
        B, T, _ = seq.shape
        gen = _tpu_generation()
        vmem = _vmem_limit(gen)
        h_flat = lstm_pallas(seq, self.w_ih, self.w_hh, self.b_ih, self.b_hh,
                             vmem_limit=vmem)                               # (B, T*H) bf16
        # Dropout: eval-mode identity (see TODO at top).
        h_2d = h_flat.reshape(B * T, self.H)                                # layout-free
        logits = vocab_proj_pallas(h_2d, self.w_lin, self.b_lin,
                                   gen=gen, vmem_limit=vmem)                # (B*T, V)
        return logits.reshape(B, T, self.V)


# --------------------------- pure-JAX f32 reference --------------------------
def reference_forward(encoder, decoder, pooled, captions):
    feats = pooled.reshape(pooled.shape[0], -1) @ encoder.w.T + encoder.b
    caps = captions[:, :-1]
    emb = jnp.take(decoder.emb, caps, axis=0)
    seq = jnp.concatenate([feats[:, None, :], emb], axis=1)     # (B, T, E)
    B = seq.shape[0]
    H = decoder.H

    def step(carry, x_t):
        h, c = carry
        gates = (x_t @ decoder.w_ih.T + decoder.b_ih
                 + h @ decoder.w_hh.T + decoder.b_hh)
        i = jax.nn.sigmoid(gates[:, 0 * H:1 * H])
        f = jax.nn.sigmoid(gates[:, 1 * H:2 * H])
        g = jnp.tanh(gates[:, 2 * H:3 * H])
        o = jax.nn.sigmoid(gates[:, 3 * H:4 * H])
        c = f * c + i * g
        h = o * jnp.tanh(c)
        return (h, c), h

    h0 = jnp.zeros((B, H), jnp.float32)
    (_, _), hs = lax.scan(step, (h0, h0), jnp.transpose(seq, (1, 0, 2)))
    lstm_out = jnp.transpose(hs, (1, 0, 2))                     # (B, T, H)
    return lstm_out @ decoder.w_lin.T + decoder.b_lin           # (B, T, V)


if __name__ == "__main__":
    embed_size, hidden_size, vocab_size = 32, 32, 1000
    batch, caption_len = 16, 32      # forward drops last token -> 31 embeds + feature = T=32

    key = jax.random.PRNGKey(0)
    k_enc, k_dec, k_img, k_cap = jax.random.split(key, 4)

    encoder = EncoderCNNPallas(embed_size, key=k_enc)
    decoder = DecoderRNNPallas(embed_size, hidden_size, vocab_size,
                               num_layers=1, key=k_dec)

    # Stand-in for the (untranslatable) pretrained ResNet-50 backbone: its
    # global-average-pooled output, shape (B, 2048, 1, 1).
    pooled = jax.random.normal(k_img, (batch, EncoderCNNPallas.IN_FEATURES, 1, 1),
                               jnp.float32)
    captions = jax.random.randint(k_cap, (batch, caption_len), 0, vocab_size,
                                  dtype=jnp.int32)

    features = encoder.forward(pooled)                    # (B, E)   Pallas GEMM
    logits = decoder.forward(features, captions)          # (B, T, V) Pallas LSTM + proj
    logits = jax.block_until_ready(logits)

    ref = jax.block_until_ready(reference_forward(encoder, decoder, pooled, captions))
    # bf16 matmul operands (f32 accumulation) vs. f32 reference -> loosened tolerance.
    np.testing.assert_allclose(np.asarray(logits), np.asarray(ref),
                               rtol=3e-2, atol=2e-2)
    assert logits.shape == (batch, caption_len, vocab_size)
    print("KERNEL_OK")
</pallas_src>

<mosaic_0001>
module attributes {stable_mosaic.version = 11 : i64} {
  func.func @_embed_kernel(%arg0: i32, %arg1: memref<16x2048xbf16, #tpu.memory_space<vmem>>, %arg2: memref<2048x32xbf16, #tpu.memory_space<vmem>>, %arg3: memref<1x32xf32, #tpu.memory_space<vmem>>, %arg4: memref<16x32xf32, #tpu.memory_space<vmem>>) attributes {dimension_semantics = [#tpu.dimension_semantics<arbitrary>], iteration_bounds = array<i64: 1>, scalar_prefetch = 0 : i64, scratch_operands = 0 : i64, tpu.core_type = #tpu.core_type<tc>, window_params = [{pipeline_mode = #tpu.pipeline_mode<synchronous>, transform_indices = @transform_0, window_bounds = array<i64: 16, 2048>}, {pipeline_mode = #tpu.pipeline_mode<synchronous>, transform_indices = @transform_1, window_bounds = array<i64: 2048, 32>}, {pipeline_mode = #tpu.pipeline_mode<synchronous>, transform_indices = @transform_2, window_bounds = array<i64: 1, 32>}, {pipeline_mode = #tpu.pipeline_mode<synchronous>, transform_indices = @transform_3, window_bounds = array<i64: 16, 32>}]} {
    %c0 = arith.constant 0 : index
    %c0_0 = arith.constant 0 : index
    %0 = vector.load %arg1[%c0, %c0_0] : memref<16x2048xbf16, #tpu.memory_space<vmem>>, vector<16x2048xbf16>
    %c0_1 = arith.constant 0 : index
    %c0_2 = arith.constant 0 : index
    %1 = vector.load %arg2[%c0_1, %c0_2] : memref<2048x32xbf16, #tpu.memory_space<vmem>>, vector<2048x32xbf16>
    %cst = arith.constant dense<0.000000e+00> : vector<16x32xf32>
    %2 = tpu.matmul %0, %1, %cst {dimension_numbers = #tpu.dot_dimension_numbers<[1], [0], [0], [1], [0, 0, 1, 1], [], []>} : vector<16x2048xbf16>, vector<2048x32xbf16>, vector<16x32xf32> -> vector<16x32xf32>
    %c0_3 = arith.constant 0 : index
    %c0_4 = arith.constant 0 : index
    %3 = vector.load %arg3[%c0_3, %c0_4] : memref<1x32xf32, #tpu.memory_space<vmem>>, vector<1x32xf32>
    %4 = vector.broadcast %3 : vector<1x32xf32> to vector<16x32xf32>
    %5 = arith.addf %2, %4 : vector<16x32xf32>
    %c0_5 = arith.constant 0 : index
    %c0_6 = arith.constant 0 : index
    %6 = vector.load %arg4[%c0_5, %c0_6] : memref<16x32xf32, #tpu.memory_space<vmem>>, vector<16x32xf32>
    tpu.vector_store %arg4[%c0_5, %c0_6], %5 {strides = array<i32>} : memref<16x32xf32, #tpu.memory_space<vmem>>, vector<16x32xf32>,
    return
  }
  func.func @transform_0(%arg0: i32) -> (i32, i32) {
    %c0_i32 = arith.constant 0 : i32
    %c0_i32_0 = arith.constant 0 : i32
    %c0_i32_1 = arith.constant 0 : i32
    return %c0_i32, %c0_i32_0 : i32, i32
  }
  func.func @transform_1(%arg0: i32) -> (i32, i32) {
    %c0_i32 = arith.constant 0 : i32
    %c0_i32_0 = arith.constant 0 : i32
    %c0_i32_1 = arith.constant 0 : i32
    return %c0_i32, %c0_i32_0 : i32, i32
  }
  func.func @transform_2(%arg0: i32) -> (i32, i32) {
    %c0_i32 = arith.constant 0 : i32
    %c0_i32_0 = arith.constant 0 : i32
    %c0_i32_1 = arith.constant 0 : i32
    return %c0_i32, %c0_i32_0 : i32, i32
  }
  func.func @transform_3(%arg0: i32) -> (i32, i32) {
    %c0_i32 = arith.constant 0 : i32
    %c0_i32_0 = arith.constant 0 : i32
    %c0_i32_1 = arith.constant 0 : i32
    return %c0_i32, %c0_i32_0 : i32, i32
  }
}

</mosaic_0001>

<bundles_post_ra>
// kernel: forward.1
= control target key start
LH: loop header
LB: loop body
LE: loop exit
PB: predicated region body
PF: predicated region fallthrough
CT: control target
= control target key end

     0   :  { %8 = vsyncpa [#allocation3], 0  ;;  %s2311_s0 = inlined_call_operand.vmem [shape: bf16[16,2048], index: 0, kind: input, shape index: {}]   ;;  %s2312_s1 = inlined_call_operand.hbm [shape: bf16[2048,32], index: 1, kind: input, shape index: {}]   ;;  %s2313_s2 = inlined_call_operand.vmem [shape: f32[1,32], index: 2, kind: input, shape index: {}]   ;;  %s2314_s3 = inlined_call_operand.hbm [shape: f32[16,32], index: 3, kind: output, shape index: {}]  }
   0x1   :  { %9 = vsyncpa [#allocation4], 0  ;;  %s16_s14 = sshll.u32 %s2312_s1, 4  ;;  %s2180_s15 = smov [#allocation2]   ;;  %s17_s14 = int_to_ptr.hbm [resolvable:$true] %s16_s14 }
   0x2   :  { %s18_s16 = sshll.u32 %s2180_s15, 4  ;;  %s2181_s17 = smov 64   ;;  %s19_s16 = int_to_ptr.vmem [resolvable:$true] %s18_s16 }
   0x3   :  { %s2182_s18 = smov 4  }
   0x4   :  { %24 = dma.hbm_to_vmem [thread:$0]  %s17_s14, 16384, %s19_s16, [#allocation3], %s2181_s17, %s2181_s17, %s2182_s18  }
   0x5   :  { %2176 = dma.done.wait [#allocation3], 16384  }
   0x6   :  { %2177 = vsyncadd [#allocation3], 4294950912  ;;  %v2000_v0 = vld [vmem:[#allocation2 + $0x38] sm:$0xff]  ;;  %v1999_v4 = vld [vmem:[#allocation2 + $0x30] sm:$0xff]  ;;  %vm1379_vm0 = vcmask 261120   ;;  %s1388_s30 = sshll.u32 %s2314_s3, 4  ;;  %s1389_s30 = int_to_ptr.hbm [resolvable:$true] %s1388_s30 }
   0x7   :  { %v2008_v1 = vld [vmem:[#allocation2 + $0x78] sm:$0xff]  ;;  %1155 = vmatpush.bf16.msra.mxu0 %v2000_v0  ;;  %v2007_v5 = vld [vmem:[#allocation2 + $0x70] sm:$0xff]  ;;  %v1998_v8 = vld [vmem:[#allocation2 + $0x28] sm:$0xff]  ;;  %s2184_s4 = smov 128   ;;  %s2185_s5 = smov 8  }
   0x8   :  { %v2016_v2 = vld [vmem:[#allocation2 + $0xb8] sm:$0xff]  ;;  %1169 = vmatpush.bf16.msra.mxu1 %v2008_v1  ;;  %v2015_v6 = vld [vmem:[#allocation2 + $0xb0] sm:$0xff]  ;;  %v2006_v9 = vld [vmem:[#allocation2 + $0x68] sm:$0xff] }
   0x9   :  { %v2024_v3 = vld [vmem:[#allocation2 + $0xf8] sm:$0xff]  ;;  %1183 = vmatpush.bf16.msra.mxu2 %v2016_v2  ;;  %v2023_v7 = vld [vmem:[#allocation2 + $0xf0] sm:$0xff]  ;;  %v2014_v10 = vld [vmem:[#allocation2 + $0xa8] sm:$0xff] }
   0xa   :  { %1197 = vmatpush.bf16.msra.mxu3 %v2024_v3  ;;  %v2022_v11 = vld [vmem:[#allocation2 + $0xe8] sm:$0xff]  ;;  %v1997_v12 = vld [vmem:[#allocation2 + $0x20] sm:$0xff]  ;;  %v1996_v16 = vld [vmem:[#allocation2 + $0x18] sm:$0xff] }
   0xb   :  { %1156 = vmatpush.bf16.msra.mxu0 %v1999_v4  ;;  %v2005_v13 = vld [vmem:[#allocation2 + $0x60] sm:$0xff]  ;;  %v2004_v17 = vld [vmem:[#allocation2 + $0x58] sm:$0xff]  ;;  %v1995_v20 = vld [vmem:[#allocation2 + $0x10] sm:$0xff] }
   0xc   :  { %1170 = vmatpush.bf16.msra.mxu1 %v2007_v5  ;;  %v2013_v14 = vld [vmem:[#allocation2 + $0xa0] sm:$0xff]  ;;  %v2012_v18 = vld [vmem:[#allocation2 + $0x98] sm:$0xff]  ;;  %v2003_v21 = vld [vmem:[#allocation2 + $0x50] sm:$0xff] }
   0xd   :  { %1184 = vmatpush.bf16.msra.mxu2 %v2015_v6  ;;  %v2021_v15 = vld [vmem:[#allocation2 + $0xe0] sm:$0xff]  ;;  %v2020_v19 = vld [vmem:[#allocation2 + $0xd8] sm:$0xff]  ;;  %v2011_v22 = vld [vmem:[#allocation2 + $0x90] sm:$0xff] }
   0xe   :  { %1198 = vmatpush.bf16.msra.mxu3 %v2023_v7  ;;  %v2019_v23 = vld [vmem:[#allocation2 + $0xd0] sm:$0xff]  ;;  %v1994_v24 = vld [vmem:[#allocation2 + $0x8] sm:$0xff]  ;;  %v1993_v28 = vld [vmem:[#allocation2] sm:$0xff] }
   0xf   :  { %1157 = vmatpush.bf16.msra.mxu0 %v1998_v8  ;;  %v2002_v25 = vld [vmem:[#allocation2 + $0x48] sm:$0xff]  ;;  %v2001_v29 = vld [vmem:[#allocation2 + $0x40] sm:$0xff]  ;;  %v2032_v32 = vld [vmem:[#allocation2 + $0x138] sm:$0xff] }
  0x10   :  { %1171 = vmatpush.bf16.msra.mxu1 %v2006_v9  ;;  %v2010_v26 = vld [vmem:[#allocation2 + $0x88] sm:$0xff]  ;;  %v2009_v30 = vld [vmem:[#allocation2 + $0x80] sm:$0xff]  ;;  %v2040_v33 = vld [vmem:[#allocation2 + $0x178] sm:$0xff] }
  0x11   :  { %1185 = vmatpush.bf16.msra.mxu2 %v2014_v10  ;;  %v2018_v27 = vld [vmem:[#allocation2 + $0xc8] sm:$0xff]  ;;  %v2017_v31 = vld [vmem:[#allocation2 + $0xc0] sm:$0xff]  ;;  %v2048_v42 = vld [vmem:[#allocation2 + $0x1b8] sm:$0xff] }
  0x12   :  { %1199 = vmatpush.bf16.msra.mxu3 %v2022_v11  ;;  %v1403_v34 = vld [vmem:[%s2311_s0] sm:$0xf]  ;;  %v1411_v36 = vld [vmem:[%s2311_s0 + $0x8] sm:$0xf]  ;;  %v1977_v38 = vld [vmem:[%s2311_s0 + $0x4] sm:$0xf] }
  0x13   :  { %1158 = vmatpush.bf16.msra.mxu0 %v1997_v12  ;;  %v1985_v35 = vld [vmem:[%s2311_s0 + $0x3c] sm:$0xf0]  ;;  %v1986_v37 = vld [vmem:[%s2311_s0 + $0x44] sm:$0xf0]  ;;  %v1405_v39 = vld [vmem:[%s2311_s0 + $0x40] sm:$0xf0] }
  0x14   :  { %1172 = vmatpush.bf16.msra.mxu1 %v2005_v13  ;;  %v1978_v40 = vld [vmem:[%s2311_s0 + $0xc] sm:$0xf]  ;;  %v2056_v43 = vld [vmem:[#allocation2 + $0x1f8] sm:$0xff]  ;;  %v1404_v44 = vor.u32 %v1985_v35, %v1403_v34  ;;  %v1412_v45 = vor.u32 %v1986_v37, %v1411_v36  ;;  %v1408_v46 = vor.u32 %v1977_v38, %v1405_v39  ;;  %v2031_v48 = vld [vmem:[#allocation2 + $0x130] sm:$0xff] }
  0x15   :  { %1186 = vmatpush.bf16.msra.mxu2 %v2013_v14  ;;  %v1413_v41 = vld [vmem:[%s2311_s0 + $0x48] sm:$0xf0]  ;;  %v2039_v49 = vld [vmem:[#allocation2 + $0x170] sm:$0xff]  ;;  %v2029_v56 = vld [vmem:[#allocation2 + $0x120] sm:$0xff] }
  0x16   :  { %1200 = vmatpush.bf16.msra.mxu3 %v2021_v15  ;;  %v1416_v47 = vor.u32 %v1978_v40, %v1413_v41  ;;  %v2047_v50 = vld [vmem:[#allocation2 + $0x1b0] sm:$0xff]  ;;  %v2030_v52 = vld [vmem:[#allocation2 + $0x128] sm:$0xff]  ;;  %v2037_v57 = vld [vmem:[#allocation2 + $0x160] sm:$0xff] }
  0x17   :  { %1159 = vmatpush.bf16.msra.mxu0 %v1996_v16  ;;  %v2055_v51 = vld [vmem:[#allocation2 + $0x1f0] sm:$0xff]  ;;  %v2038_v53 = vld [vmem:[#allocation2 + $0x168] sm:$0xff]  ;;  %v2045_v58 = vld [vmem:[#allocation2 + $0x1a0] sm:$0xff] }
  0x18   :  { %1173 = vmatpush.bf16.msra.mxu1 %v2004_v17  ;;  %v2046_v54 = vld [vmem:[#allocation2 + $0x1a8] sm:$0xff]  ;;  %v2053_v59 = vld [vmem:[#allocation2 + $0x1e0] sm:$0xff]  ;;  %v2028_v60 = vld [vmem:[#allocation2 + $0x118] sm:$0xff] }
  0x19   :  { %1187 = vmatpush.bf16.msra.mxu2 %v2012_v18  ;;  %v2054_v55 = vld [vmem:[#allocation2 + $0x1e8] sm:$0xff]  ;;  %v2036_v61 = vld [vmem:[#allocation2 + $0x158] sm:$0xff]  ;;  %v2027_v0 = vld [vmem:[#allocation2 + $0x110] sm:$0xff] }
  0x1a   :  { %1201 = vmatpush.bf16.msra.mxu3 %v2020_v19  ;;  %v2044_v62 = vld [vmem:[#allocation2 + $0x198] sm:$0xff]  ;;  %v2035_v1 = vld [vmem:[#allocation2 + $0x150] sm:$0xff]  ;;  %v2026_v4 = vld [vmem:[#allocation2 + $0x108] sm:$0xff] }
  0x1b   :  { %1160 = vmatpush.bf16.msra.mxu0 %v1995_v20  ;;  %v2052_v63 = vld [vmem:[#allocation2 + $0x1d8] sm:$0xff]  ;;  %v2043_v2 = vld [vmem:[#allocation2 + $0x190] sm:$0xff]  ;;  %v2034_v5 = vld [vmem:[#allocation2 + $0x148] sm:$0xff] }
  0x1c   :  { %1174 = vmatpush.bf16.msra.mxu1 %v2003_v21  ;;  %v2051_v3 = vld [vmem:[#allocation2 + $0x1d0] sm:$0xff]  ;;  %v2042_v6 = vld [vmem:[#allocation2 + $0x188] sm:$0xff]  ;;  %v2025_v8 = vld [vmem:[#allocation2 + $0x100] sm:$0xff] }
  0x1d   :  { %1188 = vmatpush.bf16.msra.mxu2 %v2011_v22  ;;  %v2050_v7 = vld [vmem:[#allocation2 + $0x1c8] sm:$0xff]  ;;  %v2033_v9 = vld [vmem:[#allocation2 + $0x140] sm:$0xff]  ;;  %v2064_v12 = vld [vmem:[#allocation2 + $0x238] sm:$0xff] }
  0x1e   :  { %1202 = vmatpush.bf16.msra.mxu3 %v2019_v23  ;;  %v2041_v10 = vld [vmem:[#allocation2 + $0x180] sm:$0xff]  ;;  %v2072_v13 = vld [vmem:[#allocation2 + $0x278] sm:$0xff]  ;;  %v1419_v14 = vld [vmem:[%s2311_s0 + $0x10] sm:$0xf] }
  0x1f   :  { %1161 = vmatpush.bf16.msra.mxu0 %v1994_v24  ;;  %v2049_v11 = vld [vmem:[#allocation2 + $0x1c0] sm:$0xff]  ;;  %v1987_v15 = vld [vmem:[%s2311_s0 + $0x4c] sm:$0xf0]  ;;  %v1427_v16 = vld [vmem:[%s2311_s0 + $0x18] sm:$0xf] }
  0x20   :  { %1175 = vmatpush.bf16.msra.mxu1 %v2002_v25  ;;  %v1988_v17 = vld [vmem:[%s2311_s0 + $0x54] sm:$0xf0]  ;;  %v1979_v18 = vld [vmem:[%s2311_s0 + $0x14] sm:$0xf]  ;;  %v1980_v20 = vld [vmem:[%s2311_s0 + $0x1c] sm:$0xf]  ;;  %v1420_v24 = vor.u32 %v1987_v15, %v1419_v14 }
  0x21   :  { %1189 = vmatpush.bf16.msra.mxu2 %v2010_v26  ;;  %v1421_v19 = vld [vmem:[%s2311_s0 + $0x50] sm:$0xf0]  ;;  %v1429_v21 = vld [vmem:[%s2311_s0 + $0x58] sm:$0xf0]  ;;  %v1428_v25 = vor.u32 %v1988_v17, %v1427_v16  ;;  %v2078_v34 = vld [vmem:[#allocation2 + $0x2a8] sm:$0xff] }
  0x22   :  { %1203 = vmatpush.bf16.msra.mxu3 %v2018_v27  ;;  %v2080_v22 = vld [vmem:[#allocation2 + $0x2b8] sm:$0xff]  ;;  %v1424_v26 = vor.u32 %v1979_v18, %v1421_v19  ;;  %v1432_v27 = vor.u32 %v1980_v20, %v1429_v21  ;;  %v2086_v35 = vld [vmem:[#allocation2 + $0x2e8] sm:$0xff]  ;;  %v2061_v36 = vld [vmem:[#allocation2 + $0x220] sm:$0xff] }
  0x23   :  { %1162 = vmatpush.bf16.msra.mxu0 %v1993_v28  ;;  %v2088_v23 = vld [vmem:[#allocation2 + $0x2f8] sm:$0xff]  ;;  %v2063_v28 = vld [vmem:[#allocation2 + $0x230] sm:$0xff]  ;;  %v2069_v37 = vld [vmem:[#allocation2 + $0x260] sm:$0xff] }
  0x24   :  { %1176 = vmatpush.bf16.msra.mxu1 %v2001_v29  ;;  %v2071_v29 = vld [vmem:[#allocation2 + $0x270] sm:$0xff]  ;;  %v2077_v38 = vld [vmem:[#allocation2 + $0x2a0] sm:$0xff]  ;;  %v2060_v40 = vld [vmem:[#allocation2 + $0x218] sm:$0xff] }
  0x25   :  { %1190 = vmatpush.bf16.msra.mxu2 %v2009_v30  ;;  %v2079_v30 = vld [vmem:[#allocation2 + $0x2b0] sm:$0xff]  ;;  %v2085_v39 = vld [vmem:[#allocation2 + $0x2e0] sm:$0xff]  ;;  %v2068_v41 = vld [vmem:[#allocation2 + $0x258] sm:$0xff] }
  0x26   :  { %1204 = vmatpush.bf16.msra.mxu3 %v2017_v31  ;;  %1163 = vmatmul.bf16.vlgmr.msra.gmra.mxu0 %v1404_v44  ;;  %v2087_v31 = vld [vmem:[#allocation2 + $0x2f0] sm:$0xff]  ;;  %v2110_v14 = vld [vmem:[#allocation2 + $0x3a8] sm:$0xff]  ;;  %v2093_v16 = vld [vmem:[#allocation2 + $0x320] sm:$0xff] }
  0x27   :  { %1211 = vmatpush.bf16.msrb.mxu0 %v2032_v32  ;;  %1177 = vmatmul.bf16.vlgmr.msra.gmra.mxu1 %v1408_v46  ;;  %v2062_v32 = vld [vmem:[#allocation2 + $0x228] sm:$0xff]  ;;  %v2059_v44 = vld [vmem:[#allocation2 + $0x210] sm:$0xff]  ;;  %v2101_v17 = vld [vmem:[#allocation2 + $0x360] sm:$0xff] }
  0x28   :  { %1225 = vmatpush.bf16.msrb.mxu1 %v2040_v33  ;;  %1191 = vmatmul.bf16.vlgmr.msra.gmra.mxu2 %v1412_v45  ;;  %v2070_v33 = vld [vmem:[#allocation2 + $0x268] sm:$0xff]  ;;  %v2067_v45 = vld [vmem:[#allocation2 + $0x250] sm:$0xff]  ;;  %v2109_v18 = vld [vmem:[#allocation2 + $0x3a0] sm:$0xff] }
  0x29   :  { %1239 = vmatpush.bf16.msrb.mxu2 %v2048_v42  ;;  %1205 = vmatmul.bf16.vlgmr.msra.gmra.mxu3 %v1416_v47  ;;  %v2076_v42 = vld [vmem:[#allocation2 + $0x298] sm:$0xff]  ;;  %v2075_v46 = vld [vmem:[#allocation2 + $0x290] sm:$0xff]  ;;  %v2118_v15 = vld [vmem:[#allocation2 + $0x3e8] sm:$0xff] }
  0x2a   :  { %1253 = vmatpush.bf16.msrb.mxu3 %v2056_v43  ;;  %v2084_v43 = vld [vmem:[#allocation2 + $0x2d8] sm:$0xff]  ;;  %v2083_v47 = vld [vmem:[#allocation2 + $0x2d0] sm:$0xff]  ;;  %v2117_v19 = vld [vmem:[#allocation2 + $0x3e0] sm:$0xff] }
  0x2b   :  { %1212 = vmatpush.bf16.msrb.mxu0 %v2031_v48  ;;  %v2058_v48 = vld [vmem:[#allocation2 + $0x208] sm:$0xff]  ;;  %v2092_v20 = vld [vmem:[#allocation2 + $0x318] sm:$0xff] }
  0x2c   :  { %1226 = vmatpush.bf16.msrb.mxu1 %v2039_v49  ;;  %v2066_v49 = vld [vmem:[#allocation2 + $0x248] sm:$0xff]  ;;  %v2100_v21 = vld [vmem:[#allocation2 + $0x358] sm:$0xff] }
  0x2d   :  { %1240 = vmatpush.bf16.msrb.mxu2 %v2047_v50  ;;  %v2074_v50 = vld [vmem:[#allocation2 + $0x288] sm:$0xff] }
  0x2e   :  { %1254 = vmatpush.bf16.msrb.mxu3 %v2055_v51  ;;  %v2082_v51 = vld [vmem:[#allocation2 + $0x2c8] sm:$0xff] }
  0x2f   :  { %1213 = vmatpush.bf16.msrb.mxu0 %v2030_v52  ;;  %v2057_v52 = vld [vmem:[#allocation2 + $0x200] sm:$0xff] }
  0x30   :  { %1227 = vmatpush.bf16.msrb.mxu1 %v2038_v53  ;;  %v2065_v53 = vld [vmem:[#allocation2 + $0x240] sm:$0xff] }
  0x31   :  { %1241 = vmatpush.bf16.msrb.mxu2 %v2046_v54  ;;  %v2073_v54 = vld [vmem:[#allocation2 + $0x280] sm:$0xff] }
  0x32   :  { %1255 = vmatpush.bf16.msrb.mxu3 %v2054_v55  ;;  %v2081_v55 = vld [vmem:[#allocation2 + $0x2c0] sm:$0xff] }
  0x33   :  { %1214 = vmatpush.bf16.msrb.mxu0 %v2029_v56  ;;  %v2096_v56 = vld [vmem:[#allocation2 + $0x338] sm:$0xff] }
  0x34   :  { %1228 = vmatpush.bf16.msrb.mxu1 %v2037_v57  ;;  %v2104_v57 = vld [vmem:[#allocation2 + $0x378] sm:$0xff] }
  0x35   :  { %1242 = vmatpush.bf16.msrb.mxu2 %v2045_v58  ;;  %v1435_v58 = vld [vmem:[%s2311_s0 + $0x20] sm:$0xf] }
  0x36   :  { %1256 = vmatpush.bf16.msrb.mxu3 %v2053_v59  ;;  %v1989_v59 = vld [vmem:[%s2311_s0 + $0x5c] sm:$0xf0] }
  0x37   :  { %1215 = vmatpush.bf16.msrb.mxu0 %v2028_v60  ;;  %v1443_v60 = vld [vmem:[%s2311_s0 + $0x28] sm:$0xf] }
  0x38   :  { %1229 = vmatpush.bf16.msrb.mxu1 %v2036_v61  ;;  %v1990_v61 = vld [vmem:[%s2311_s0 + $0x64] sm:$0xf0] }
  0x39   :  { %1243 = vmatpush.bf16.msrb.mxu2 %v2044_v62  ;;  %v1981_v62 = vld [vmem:[%s2311_s0 + $0x24] sm:$0xf] }
  0x3a   :  { %1257 = vmatpush.bf16.msrb.mxu3 %v2052_v63  ;;  %v1437_v63 = vld [vmem:[%s2311_s0 + $0x60] sm:$0xf0] }
  0x3b   :  { %1216 = vmatpush.bf16.msrb.mxu0 %v2027_v0  ;;  %v1982_v0 = vld [vmem:[%s2311_s0 + $0x2c] sm:$0xf] }
  0x3c   :  { %1230 = vmatpush.bf16.msrb.mxu1 %v2035_v1  ;;  %v1445_v1 = vld [vmem:[%s2311_s0 + $0x68] sm:$0xf0] }
  0x3d   :  { %1244 = vmatpush.bf16.msrb.mxu2 %v2043_v2  ;;  %v2112_v2 = vld [vmem:[#allocation2 + $0x3b8] sm:$0xff] }
  0x3e   :  { %1258 = vmatpush.bf16.msrb.mxu3 %v2051_v3  ;;  %v2120_v3 = vld [vmem:[#allocation2 + $0x3f8] sm:$0xff] }
  0x3f   :  { %1217 = vmatpush.bf16.msrb.mxu0 %v2026_v4  ;;  %v1436_v4 = vor.u32 %v1989_v59, %v1435_v58 }
  0x40   :  { %1231 = vmatpush.bf16.msrb.mxu1 %v2034_v5  ;;  %v1444_v5 = vor.u32 %v1990_v61, %v1443_v60 }
  0x41   :  { %1245 = vmatpush.bf16.msrb.mxu2 %v2042_v6  ;;  %v1440_v6 = vor.u32 %v1981_v62, %v1437_v63 }
  0x42   :  { %1259 = vmatpush.bf16.msrb.mxu3 %v2050_v7  ;;  %v1448_v7 = vor.u32 %v1982_v0, %v1445_v1 }
  0x43   :  { %1218 = vmatpush.bf16.msrb.mxu0 %v2025_v8  ;;  %v2095_v8 = vld [vmem:[#allocation2 + $0x330] sm:$0xff] }
  0x44   :  { %1232 = vmatpush.bf16.msrb.mxu1 %v2033_v9  ;;  %v2103_v9 = vld [vmem:[#allocation2 + $0x370] sm:$0xff] }
  0x45   :  { %1246 = vmatpush.bf16.msrb.mxu2 %v2041_v10  ;;  %v2111_v10 = vld [vmem:[#allocation2 + $0x3b0] sm:$0xff] }
  0x46   :  { %1260 = vmatpush.bf16.msrb.mxu3 %v2049_v11  ;;  %1219 = vmatmul.bf16.vlgmr.msrb.gmra.mxu0 %v1420_v24  ;;  %v2119_v11 = vld [vmem:[#allocation2 + $0x3f0] sm:$0xff] }
  0x47   :  { %1267 = vmatpush.bf16.msra.mxu0 %v2064_v12  ;;  %1233 = vmatmul.bf16.vlgmr.msrb.gmra.mxu1 %v1424_v26  ;;  %v2094_v12 = vld [vmem:[#allocation2 + $0x328] sm:$0xff]  ;;  %v2091_v24 = vld [vmem:[#allocation2 + $0x310] sm:$0xff] }
  0x48   :  { %1281 = vmatpush.bf16.msra.mxu1 %v2072_v13  ;;  %1247 = vmatmul.bf16.vlgmr.msrb.gmra.mxu2 %v1428_v25  ;;  %v2102_v13 = vld [vmem:[#allocation2 + $0x368] sm:$0xff]  ;;  %v2099_v25 = vld [vmem:[#allocation2 + $0x350] sm:$0xff] }
  0x49   :  { %1295 = vmatpush.bf16.msra.mxu2 %v2080_v22  ;;  %1261 = vmatmul.bf16.vlgmr.msrb.gmra.mxu3 %v1432_v27  ;;  %v2108_v22 = vld [vmem:[#allocation2 + $0x398] sm:$0xff]  ;;  %v2107_v26 = vld [vmem:[#allocation2 + $0x390] sm:$0xff] }
  0x4a   :  { %1309 = vmatpush.bf16.msra.mxu3 %v2088_v23  ;;  %v2116_v23 = vld [vmem:[#allocation2 + $0x3d8] sm:$0xff]  ;;  %v2115_v27 = vld [vmem:[#allocation2 + $0x3d0] sm:$0xff] }
  0x4b   :  { %1268 = vmatpush.bf16.msra.mxu0 %v2063_v28  ;;  %v2090_v28 = vld [vmem:[#allocation2 + $0x308] sm:$0xff] }
  0x4c   :  { %1282 = vmatpush.bf16.msra.mxu1 %v2071_v29  ;;  %v2098_v29 = vld [vmem:[#allocation2 + $0x348] sm:$0xff] }
  0x4d   :  { %1296 = vmatpush.bf16.msra.mxu2 %v2079_v30  ;;  %v2106_v30 = vld [vmem:[#allocation2 + $0x388] sm:$0xff] }
  0x4e   :  { %1310 = vmatpush.bf16.msra.mxu3 %v2087_v31  ;;  %v2114_v31 = vld [vmem:[#allocation2 + $0x3c8] sm:$0xff] }
  0x4f   :  { %1269 = vmatpush.bf16.msra.mxu0 %v2062_v32  ;;  %v2089_v32 = vld [vmem:[#allocation2 + $0x300] sm:$0xff] }
  0x50   :  { %1283 = vmatpush.bf16.msra.mxu1 %v2070_v33  ;;  %v2097_v33 = vld [vmem:[#allocation2 + $0x340] sm:$0xff] }
  0x51   :  { %1297 = vmatpush.bf16.msra.mxu2 %v2078_v34  ;;  %v2105_v34 = vld [vmem:[#allocation2 + $0x380] sm:$0xff] }
  0x52   :  { %1311 = vmatpush.bf16.msra.mxu3 %v2086_v35  ;;  %v2113_v35 = vld [vmem:[#allocation2 + $0x3c0] sm:$0xff] }
  0x53   :  { %1270 = vmatpush.bf16.msra.mxu0 %v2061_v36  ;;  %v1451_v36 = vld [vmem:[%s2311_s0 + $0x30] sm:$0xf] }
  0x54   :  { %1284 = vmatpush.bf16.msra.mxu1 %v2069_v37  ;;  %v1991_v37 = vld [vmem:[%s2311_s0 + $0x6c] sm:$0xf0] }
  0x55   :  { %1298 = vmatpush.bf16.msra.mxu2 %v2077_v38  ;;  %v1983_v38 = vld [vmem:[%s2311_s0 + $0x34] sm:$0xf] }
  0x56   :  { %1312 = vmatpush.bf16.msra.mxu3 %v2085_v39  ;;  %v1453_v39 = vld [vmem:[%s2311_s0 + $0x70] sm:$0xf0] }
  0x57   :  { %1271 = vmatpush.bf16.msra.mxu0 %v2060_v40  ;;  %v1459_v40 = vld [vmem:[%s2311_s0 + $0x38] sm:$0xf] }
  0x58   :  { %1285 = vmatpush.bf16.msra.mxu1 %v2068_v41  ;;  %v1992_v41 = vld [vmem:[%s2311_s0 + $0x74] sm:$0xf0] }
  0x59   :  { %1299 = vmatpush.bf16.msra.mxu2 %v2076_v42  ;;  %v1984_v42 = vld [vmem:[%s2311_s0 + $0x3c] sm:$0xf] }
  0x5a   :  { %1313 = vmatpush.bf16.msra.mxu3 %v2084_v43  ;;  %v1461_v43 = vld [vmem:[%s2311_s0 + $0x78] sm:$0xf0]  ;;  %s2183_s0 = smov [#allocation5]  }
  0x5b   :  { %1272 = vmatpush.bf16.msra.mxu0 %v2059_v44  ;;  %v1452_v44 = vor.u32 %v1991_v37, %v1451_v36 }
  0x5c   :  { %1286 = vmatpush.bf16.msra.mxu1 %v2067_v45  ;;  %v1456_v45 = vor.u32 %v1983_v38, %v1453_v39 }
  0x5d   :  { %1300 = vmatpush.bf16.msra.mxu2 %v2075_v46  ;;  %v1460_v46 = vor.u32 %v1992_v41, %v1459_v40 }
  0x5e   :  { %1314 = vmatpush.bf16.msra.mxu3 %v2083_v47  ;;  %v1464_v47 = vor.u32 %v1984_v42, %v1461_v43 }
  0x5f   :  { %1273 = vmatpush.bf16.msra.mxu0 %v2058_v48 }
  0x60   :  { %1287 = vmatpush.bf16.msra.mxu1 %v2066_v49 }
  0x61   :  { %1301 = vmatpush.bf16.msra.mxu2 %v2074_v50 }
  0x62   :  { %1315 = vmatpush.bf16.msra.mxu3 %v2082_v51 }
  0x63   :  { %1274 = vmatpush.bf16.msra.mxu0 %v2057_v52 }
  0x64   :  { %1288 = vmatpush.bf16.msra.mxu1 %v2065_v53  ;;  %v2127_v53 = vld [vmem:[%s2313_s2] ss:$0 sm:$0xff]  ;;  %s1386_s2 = sshll.u32 %s2183_s0, 4  ;;  %s1387_s2 = int_to_ptr.vmem [resolvable:$true] %s1386_s2 }
  0x65   :  { %1302 = vmatpush.bf16.msra.mxu2 %v2073_v54 }
  0x66   :  { %1316 = vmatpush.bf16.msra.mxu3 %v2081_v55  ;;  %1275 = vmatmul.bf16.vlgmr.msra.gmra.mxu0 %v1436_v4 }
  0x67   :  { %1323 = vmatpush.bf16.msrb.mxu0 %v2096_v56  ;;  %1289 = vmatmul.bf16.vlgmr.msra.gmra.mxu1 %v1440_v6 }
  0x68   :  { %1337 = vmatpush.bf16.msrb.mxu1 %v2104_v57  ;;  %1303 = vmatmul.bf16.vlgmr.msra.gmra.mxu2 %v1444_v5 }
  0x69   :  { %1351 = vmatpush.bf16.msrb.mxu2 %v2112_v2  ;;  %1317 = vmatmul.bf16.vlgmr.msra.gmra.mxu3 %v1448_v7 }
  0x6a   :  { %1365 = vmatpush.bf16.msrb.mxu3 %v2120_v3 }
  0x6b   :  { %1324 = vmatpush.bf16.msrb.mxu0 %v2095_v8 }
  0x6c   :  { %1338 = vmatpush.bf16.msrb.mxu1 %v2103_v9 }
  0x6d   :  { %1352 = vmatpush.bf16.msrb.mxu2 %v2111_v10 }
  0x6e   :  { %1366 = vmatpush.bf16.msrb.mxu3 %v2119_v11 }
  0x6f   :  { %1325 = vmatpush.bf16.msrb.mxu0 %v2094_v12 }
  0x70   :  { %1339 = vmatpush.bf16.msrb.mxu1 %v2102_v13 }
  0x71   :  { %1353 = vmatpush.bf16.msrb.mxu2 %v2110_v14 }
  0x72   :  { %1367 = vmatpush.bf16.msrb.mxu3 %v2118_v15 }
  0x73   :  { %1326 = vmatpush.bf16.msrb.mxu0 %v2093_v16 }
  0x74   :  { %1340 = vmatpush.bf16.msrb.mxu1 %v2101_v17 }
  0x75   :  { %1354 = vmatpush.bf16.msrb.mxu2 %v2109_v18 }
  0x76   :  { %1368 = vmatpush.bf16.msrb.mxu3 %v2117_v19 }
  0x77   :  { %1327 = vmatpush.bf16.msrb.mxu0 %v2092_v20 }
  0x78   :  { %1341 = vmatpush.bf16.msrb.mxu1 %v2100_v21 }
  0x79   :  { %1355 = vmatpush.bf16.msrb.mxu2 %v2108_v22 }
  0x7a   :  { %1369 = vmatpush.bf16.msrb.mxu3 %v2116_v23 }
  0x7b   :  { %1328 = vmatpush.bf16.msrb.mxu0 %v2091_v24 }
  0x7c   :  { %1342 = vmatpush.bf16.msrb.mxu1 %v2099_v25 }
  0x7d   :  { %1356 = vmatpush.bf16.msrb.mxu2 %v2107_v26 }
  0x7e   :  { %1370 = vmatpush.bf16.msrb.mxu3 %v2115_v27 }
  0x7f   :  { %1329 = vmatpush.bf16.msrb.mxu0 %v2090_v28 }
  0x80   :  { %1343 = vmatpush.bf16.msrb.mxu1 %v2098_v29 }
  0x81   :  { %1357 = vmatpush.bf16.msrb.mxu2 %v2106_v30 }
  0x82   :  { %1371 = vmatpush.bf16.msrb.mxu3 %v2114_v31 }
  0x83   :  { %1330 = vmatpush.bf16.msrb.mxu0 %v2089_v32 }
  0x84   :  { %1344 = vmatpush.bf16.msrb.mxu1 %v2097_v33 }
  0x85   :  { %1358 = vmatpush.bf16.msrb.mxu2 %v2105_v34 }
  0x86   :  { %1372 = vmatpush.bf16.msrb.mxu3 %v2113_v35  ;;  %1331 = vmatmul.bf16.vlgmr.msrb.gmra.mxu0 %v1452_v44 }
  0x87   :  { %1345 = vmatmul.bf16.vlgmr.msrb.gmra.mxu1 %v1456_v45 }
  0x88   :  { %1359 = vmatmul.bf16.vlgmr.msrb.gmra.mxu2 %v1460_v46 }
  0x89   :  { %1373 = vmatmul.bf16.vlgmr.msrb.gmra.mxu3 %v1464_v47 }
  0xa3   :  { %v1164_v48 = vpop.f32.mrf.mxu0 }
  0xa4   :  { %v1178_v49 = vpop.f32.mrf.mxu1  ;;  %v1165_v55 = vadd.f32 %v2127_v53, %v1164_v48 }
  0xa6   :  { %v1179_v58 = vadd.f32 %v1178_v49, %v1165_v55 }
  0xab   :  { %v1192_v50 = vpop.f32.mrf.mxu2  ;;  %v1166_v52 = vpop.f32.mrf.mxu0 }
  0xac   :  { %v1206_v51 = vpop.f32.mrf.mxu3  ;;  %v1180_v54 = vpop.f32.mrf.mxu1  ;;  %v1193_v61 = vadd.f32 %v1192_v50, %v1179_v58  ;;  %v1167_v62 = vadd.f32 %v2127_v53, %v1166_v52 }
  0xae   :  { %v1207_v1 = vadd.f32 %v1206_v51, %v1193_v61  ;;  %v1181_v2 = vadd.f32 %v1180_v54, %v1167_v62 }
  0xb3   :  { %v1194_v56 = vpop.f32.mrf.mxu2 }
  0xb4   :  { %v1208_v57 = vpop.f32.mrf.mxu3  ;;  %v1195_v6 = vadd.f32 %v1194_v56, %v1181_v2 }
  0xb6   :  { %v1209_v10 = vadd.f32 %v1208_v57, %v1195_v6 }
  0xc3   :  { %v1220_v59 = vpop.f32.mrf.mxu0 }
  0xc4   :  { %v1234_v60 = vpop.f32.mrf.mxu1  ;;  %v1221_v4 = vadd.f32 %v1220_v59, %v1207_v1 }
  0xc6   :  { %v1235_v7 = vadd.f32 %v1234_v60, %v1221_v4 }
  0xcb   :  { %v1248_v63 = vpop.f32.mrf.mxu2  ;;  %v1222_v3 = vpop.f32.mrf.mxu0 }
  0xcc   :  { %v1262_v0 = vpop.f32.mrf.mxu3  ;;  %v1236_v5 = vpop.f32.mrf.mxu1  ;;  %v1249_v12 = vadd.f32 %v1248_v63, %v1235_v7  ;;  %v1223_v14 = vadd.f32 %v1222_v3, %v1209_v10 }
  0xce   :  { %v1263_v15 = vadd.f32 %v1262_v0, %v1249_v12  ;;  %v1237_v18 = vadd.f32 %v1236_v5, %v1223_v14 }
  0xd3   :  { %v1250_v8 = vpop.f32.mrf.mxu2 }
  0xd4   :  { %v1264_v9 = vpop.f32.mrf.mxu3  ;;  %v1251_v20 = vadd.f32 %v1250_v8, %v1237_v18 }
  0xd6   :  { %v1265_v24 = vadd.f32 %v1264_v9, %v1251_v20 }
  0xe3   :  { %v1276_v11 = vpop.f32.mrf.mxu0 }
  0xe4   :  { %v1290_v13 = vpop.f32.mrf.mxu1  ;;  %v1277_v19 = vadd.f32 %v1276_v11, %v1263_v15 }
  0xe6   :  { %v1291_v22 = vadd.f32 %v1290_v13, %v1277_v19 }
  0xeb   :  { %v1304_v16 = vpop.f32.mrf.mxu2  ;;  %v1278_v21 = vpop.f32.mrf.mxu0 }
  0xec   :  { %v1318_v17 = vpop.f32.mrf.mxu3  ;;  %v1292_v23 = vpop.f32.mrf.mxu1  ;;  %v1305_v25 = vadd.f32 %v1304_v16, %v1291_v22  ;;  %v1279_v26 = vadd.f32 %v1278_v21, %v1265_v24 }
  0xee   :  { %v1319_v29 = vadd.f32 %v1318_v17, %v1305_v25  ;;  %v1293_v31 = vadd.f32 %v1292_v23, %v1279_v26 }
  0xf3   :  { %v1306_v27 = vpop.f32.mrf.mxu2 }
  0xf4   :  { %v1320_v28 = vpop.f32.mrf.mxu3  ;;  %v1307_v34 = vadd.f32 %v1306_v27, %v1293_v31 }
  0xf6   :  { %v1321_v38 = vadd.f32 %v1320_v28, %v1307_v34 }
 0x103   :  { %v1332_v30 = vpop.f32.mrf.mxu0 }
 0x104   :  { %v1333_v32 = vadd.f32 %v1332_v30, %v1319_v29  ;;  %v1346_v33 = vpop.f32.mrf.mxu1 }
 0x106   :  { %v1347_v35 = vadd.f32 %v1346_v33, %v1333_v32 }
 0x10b   :  { %v1360_v36 = vpop.f32.mrf.mxu2  ;;  %v1334_v40 = vpop.f32.mrf.mxu0 }
 0x10c   :  { %v1374_v37 = vpop.f32.mrf.mxu3  ;;  %v1361_v39 = vadd.f32 %v1360_v36, %v1347_v35  ;;  %v1335_v42 = vadd.f32 %v1334_v40, %v1321_v38  ;;  %v1348_v43 = vpop.f32.mrf.mxu1 }
 0x10e   :  { %v1375_v41 = vadd.f32 %v1374_v37, %v1361_v39  ;;  %v1349_v44 = vadd.f32 %v1348_v43, %v1335_v42 }
 0x110   :  { %1380 = vst.msk [vmem:[#allocation5] sm:$0xff] %vm1379_vm0, %v1375_v41 }
 0x113   :  { %v1362_v45 = vpop.f32.mrf.mxu2 }
 0x114   :  { %v1363_v46 = vadd.f32 %v1362_v45, %v1349_v44  ;;  %v1376_v47 = vpop.f32.mrf.mxu3 }
 0x116   :  { %v1377_v48 = vadd.f32 %v1376_v47, %v1363_v46 }
 0x118   :  { %1381 = vst.msk [vmem:[#allocation5 + $0x8] sm:$0xff] %vm1379_vm0, %v1377_v48 }
 0x119   :  { %1394 = dma.vmem_to_hbm [thread:$0]  %s1387_s2, 256, %s1389_s30, [#allocation4], %s2184_s4, %s2184_s4, %s2185_s5  }
 0x11a   :  { %2178 = dma.done.wait [#allocation4], 256  }
 0x11b   :  { %2179 = vsyncadd [#allocation4], 4294967040 }
 0x11c   :  { %1399 = vsyncpa [#allocation3], 1 }
 0x11d   :  { %1400 = vsyncpa [#allocation4], 1 }

</bundles_post_ra>
